<compile_context>
chip_gen: v7x
topology: tpu7x:2x2x1
jax: 0.10.0
libtpu: 0.0.40
codegen_flags: <defaults>
</compile_context>

<pallas_src>
import functools

import jax
import jax.numpy as jnp
from jax.experimental import pallas as pl
from jax.experimental.pallas import tpu as pltpu

BN_EPS = 1e-5


def _mlp_kernel(n_hidden_layers, *refs):
    """Fused MLP forward on one batch tile.

    refs layout:
      refs[0]                         : x tile        (TM, input_size)  f32
      then per hidden layer (n_hidden_layers times):
        W_folded (in, out)  bf16 , b_folded (1, out)  f32
      then: w_out_row (1, prev) f32, b_out (1, 1) f32
      refs[-1]                        : output tile   (TM, 1)           f32
    """
    x_ref = refs[0]
    out_ref = refs[-1]

    h = x_ref[...].astype(jnp.float32)
    idx = 1
    for _ in range(n_hidden_layers):
        w_ref, b_ref = refs[idx], refs[idx + 1]
        idx += 2
        # MXU matmul: bf16 operands, f32 accumulation.  Bias + ReLU stay f32 on the
        # VPU (free slots relative to the binding MXU push; no bf16 VPU on v5e).
        h = jnp.dot(h.astype(w_ref.dtype), w_ref[...],
                    preferred_element_type=jnp.float32) + b_ref[...]
        h = jnp.maximum(h, 0.0)
        # Dropout: identity at inference.

    # Final Linear(prev, 1) as a broadcast-multiply + lane reduction (keeps the
    # N=1 layer off the MXU).  Kept f32 end to end.
    w_out_ref, b_out_ref = refs[idx], refs[idx + 1]
    out = jnp.sum(h * w_out_ref[...], axis=-1, keepdims=True) + b_out_ref[...]
    out_ref[...] = out.astype(out_ref.dtype)


def fold_params(params, *, weight_dtype=jnp.bfloat16):
    """Fold eval-mode BatchNorm into each hidden Linear.

    Hidden weights are cast to `weight_dtype` (bf16 by default) for the MXU; biases,
    the final-layer row vector and the final bias stay f32 (VPU path).
    """
    folded_hidden = []
    for lp in params["hidden"]:
        scale = lp["gamma"] * jax.lax.rsqrt(lp["var"] + BN_EPS)        # (1, h)
        w_f = (lp["w"] * scale).astype(weight_dtype)                   # (prev, h)
        b_f = ((lp["b"] - lp["mean"]) * scale + lp["beta"]).astype(jnp.float32)
        folded_hidden.append((w_f, b_f))
    w_out, b_out = params["out"]
    w_out_row = w_out.reshape(1, -1).astype(jnp.float32)               # (1, prev)
    return folded_hidden, w_out_row, b_out.astype(jnp.float32)


def _choose_tm(batch):
    """Pick the batch tile.

    - Small batches: one tile, rounded up to the 8-sublane granularity.
    - Larger batches: tiles of up to 2048 rows (amortizes the ~0.35 us per-grid-step
      overhead), with >=2 grid steps so both v7x TensorCores get a share, and the
      tile sized so total padding is < 8 rows per step (keeps the wrapper jnp.pad
      copy negligible).
    """
    padded8 = max(8, pl.cdiv(batch, 8) * 8)
    if padded8 <= 256:
        return padded8
    n_steps = max(2, pl.cdiv(padded8, 2048))
    return pl.cdiv(pl.cdiv(padded8, n_steps), 8) * 8


def mlp_forward(x, folded_hidden, w_out_row, b_out, *, tm=None):
    batch, in_features = x.shape
    if tm is None:
        tm = _choose_tm(batch)

    padded = pl.cdiv(batch, tm) * tm
    if padded != batch:
        # With _choose_tm this pads only a handful of rows (never a near-full tile).
        x = jnp.pad(x, ((0, padded - batch), (0, 0)))

    n_hidden = len(folded_hidden)

    flat_inputs = [x]
    for w, b in folded_hidden:
        flat_inputs.extend([w, b])
    flat_inputs.extend([w_out_row, b_out])

    # x / output tiles stream over the batch grid; all params stay VMEM-resident
    # (constant block index across grid steps -> no re-DMA).
    in_specs = [pl.BlockSpec((tm, in_features), lambda i: (i, 0))]
    for w, b in folded_hidden:
        in_specs.append(pl.BlockSpec(w.shape, lambda i: (0, 0)))
        in_specs.append(pl.BlockSpec(b.shape, lambda i: (0, 0)))
    in_specs.append(pl.BlockSpec(w_out_row.shape, lambda i: (0, 0)))
    in_specs.append(pl.BlockSpec(b_out.shape, lambda i: (0, 0)))
    out_spec = pl.BlockSpec((tm, 1), lambda i: (i, 0))

    kernel = functools.partial(_mlp_kernel, n_hidden)

    out = pl.pallas_call(
        kernel,
        out_shape=jax.ShapeDtypeStruct((padded, 1), jnp.float32),
        grid=(padded // tm,),
        in_specs=in_specs,
        out_specs=out_spec,
        compiler_params=pltpu.CompilerParams(dimension_semantics=("parallel",)),
    )(*flat_inputs)
    return out[:batch]


def init_params(key, input_size, hidden_sizes):
    """Deterministic parameter init mirroring the PyTorch module's shapes."""
    params = {"hidden": [], "out": None}
    prev = input_size
    for h in hidden_sizes:
        key, kw, kb, km, kv = jax.random.split(key, 5)
        # Linear(prev, h): PyTorch weight is (h, prev); we store transposed (prev, h).
        w = jax.random.normal(kw, (prev, h), jnp.float32) * (1.0 / jnp.sqrt(prev))
        b = jax.random.normal(kb, (1, h), jnp.float32) * 0.01
        gamma = jnp.ones((1, h), jnp.float32)
        beta = jnp.zeros((1, h), jnp.float32)
        mean = jax.random.normal(km, (1, h), jnp.float32) * 0.05
        var = jnp.abs(jax.random.normal(kv, (1, h), jnp.float32)) * 0.1 + 1.0
        params["hidden"].append(
            dict(w=w, b=b, gamma=gamma, beta=beta, mean=mean, var=var))
        prev = h
    key, kw, kb = jax.random.split(key, 3)
    w_out = jax.random.normal(kw, (prev, 1), jnp.float32) * (1.0 / jnp.sqrt(prev))
    b_out = jax.random.normal(kb, (1, 1), jnp.float32) * 0.01
    params["out"] = (w_out, b_out)
    return params


def mlp_reference_f32(x, params):
    """Plain-JAX f32 reference (unfolded BN, eval mode)."""
    h = x
    for lp in params["hidden"]:
        h = h @ lp["w"] + lp["b"]
        h = (h - lp["mean"]) * jax.lax.rsqrt(lp["var"] + BN_EPS) * lp["gamma"] + lp["beta"]
        h = jnp.maximum(h, 0.0)
    w_out, b_out = params["out"]
    return h @ w_out + b_out


def mlp_reference_folded(x, folded_hidden, w_out_row, b_out):
    """Plain-JAX reference using exactly the folded/bf16 params the kernel sees."""
    h = x.astype(jnp.float32)
    for w, b in folded_hidden:
        h = jnp.dot(h.astype(w.dtype), w, preferred_element_type=jnp.float32) + b
        h = jnp.maximum(h, 0.0)
    return jnp.sum(h * w_out_row, axis=-1, keepdims=True) + b_out


if __name__ == "__main__":
    key = jax.random.PRNGKey(0)
    key, kx = jax.random.split(key)

    batch = 8
    input_size = 64
    hidden_sizes = [512, 256, 128, 64]   # module defaults

    x = jax.random.normal(kx, (batch, input_size), jnp.float32)
    params = init_params(key, input_size, hidden_sizes)
    folded_hidden, w_out_row, b_out = fold_params(params)

    # TODO(synk): optional fp8 weight storage for the wide layers on v7x (profile-driven).
    out = mlp_forward(x, folded_hidden, w_out_row, b_out)
    out = jax.block_until_ready(out)
    assert out.shape == (batch, 1), out.shape

    # Tight check against a plain-JAX model using the same folded bf16 weights.
    ref_folded = mlp_reference_folded(x, folded_hidden, w_out_row, b_out)
    assert jnp.allclose(out, ref_folded, atol=1e-2, rtol=1e-2), (
        f"max abs err vs folded ref = {jnp.max(jnp.abs(out - ref_folded))}")

    # Loose check against the f32 eval-mode reference (bf16 matmul operands).
    ref_f32 = mlp_reference_f32(x, params)
    assert jnp.allclose(out, ref_f32, atol=5e-2, rtol=5e-2), (
        f"max abs err vs f32 ref = {jnp.max(jnp.abs(out - ref_f32))}")

    print("KERNEL_OK")
</pallas_src>

<mosaic_0001>
module attributes {stable_mosaic.version = 11 : i64} {
  func.func @_mlp_kernel(%arg0: i32, %arg1: memref<8x64xf32, #tpu.memory_space<vmem>>, %arg2: memref<64x512xbf16, #tpu.memory_space<vmem>>, %arg3: memref<1x512xf32, #tpu.memory_space<vmem>>, %arg4: memref<512x256xbf16, #tpu.memory_space<vmem>>, %arg5: memref<1x256xf32, #tpu.memory_space<vmem>>, %arg6: memref<256x128xbf16, #tpu.memory_space<vmem>>, %arg7: memref<1x128xf32, #tpu.memory_space<vmem>>, %arg8: memref<128x64xbf16, #tpu.memory_space<vmem>>, %arg9: memref<1x64xf32, #tpu.memory_space<vmem>>, %arg10: memref<1x64xf32, #tpu.memory_space<vmem>>, %arg11: memref<1x1xf32, #tpu.memory_space<vmem>>, %arg12: memref<8x1xf32, #tpu.memory_space<vmem>>) attributes {dimension_semantics = [#tpu.dimension_semantics<parallel>], iteration_bounds = array<i64: 1>, scalar_prefetch = 0 : i64, scratch_operands = 0 : i64, tpu.core_type = #tpu.core_type<tc>, window_params = [{transform_indices = @transform_0, window_bounds = array<i64: 8, 64>}, {pipeline_mode = #tpu.pipeline_mode<synchronous>, transform_indices = @transform_1, window_bounds = array<i64: 64, 512>}, {pipeline_mode = #tpu.pipeline_mode<synchronous>, transform_indices = @transform_2, window_bounds = array<i64: 1, 512>}, {pipeline_mode = #tpu.pipeline_mode<synchronous>, transform_indices = @transform_3, window_bounds = array<i64: 512, 256>}, {pipeline_mode = #tpu.pipeline_mode<synchronous>, transform_indices = @transform_4, window_bounds = array<i64: 1, 256>}, {pipeline_mode = #tpu.pipeline_mode<synchronous>, transform_indices = @transform_5, window_bounds = array<i64: 256, 128>}, {pipeline_mode = #tpu.pipeline_mode<synchronous>, transform_indices = @transform_6, window_bounds = array<i64: 1, 128>}, {pipeline_mode = #tpu.pipeline_mode<synchronous>, transform_indices = @transform_7, window_bounds = array<i64: 128, 64>}, {pipeline_mode = #tpu.pipeline_mode<synchronous>, transform_indices = @transform_8, window_bounds = array<i64: 1, 64>}, {pipeline_mode = #tpu.pipeline_mode<synchronous>, transform_indices = @transform_9, window_bounds = array<i64: 1, 64>}, {pipeline_mode = #tpu.pipeline_mode<synchronous>, transform_indices = @transform_10, window_bounds = array<i64: 1, 1>}, {transform_indices = @transform_11, window_bounds = array<i64: 8, 1>}]} {
    %c0 = arith.constant 0 : index
    %c0_0 = arith.constant 0 : index
    %0 = vector.load %arg1[%c0, %c0_0] : memref<8x64xf32, #tpu.memory_space<vmem>>, vector<8x64xf32>
    %1 = arith.truncf %0 : vector<8x64xf32> to vector<8x64xbf16>
    %c0_1 = arith.constant 0 : index
    %c0_2 = arith.constant 0 : index
    %2 = vector.load %arg2[%c0_1, %c0_2] : memref<64x512xbf16, #tpu.memory_space<vmem>>, vector<64x512xbf16>
    %cst = arith.constant dense<0.000000e+00> : vector<8x512xf32>
    %3 = tpu.matmul %1, %2, %cst {dimension_numbers = #tpu.dot_dimension_numbers<[1], [0], [0], [1], [0, 0, 1, 1], [], []>} : vector<8x64xbf16>, vector<64x512xbf16>, vector<8x512xf32> -> vector<8x512xf32>
    %c0_3 = arith.constant 0 : index
    %c0_4 = arith.constant 0 : index
    %4 = vector.load %arg3[%c0_3, %c0_4] : memref<1x512xf32, #tpu.memory_space<vmem>>, vector<1x512xf32>
    %5 = vector.broadcast %4 : vector<1x512xf32> to vector<8x512xf32>
    %6 = arith.addf %3, %5 : vector<8x512xf32>
    %cst_5 = arith.constant 0.000000e+00 : f32
    %7 = vector.broadcast %cst_5 : f32 to vector<8x512xf32>
    %8 = arith.maximumf %6, %7 : vector<8x512xf32>
    %9 = arith.truncf %8 : vector<8x512xf32> to vector<8x512xbf16>
    %c0_6 = arith.constant 0 : index
    %c0_7 = arith.constant 0 : index
    %10 = vector.load %arg4[%c0_6, %c0_7] : memref<512x256xbf16, #tpu.memory_space<vmem>>, vector<512x256xbf16>
    %cst_8 = arith.constant dense<0.000000e+00> : vector<8x256xf32>
    %11 = tpu.matmul %9, %10, %cst_8 {dimension_numbers = #tpu.dot_dimension_numbers<[1], [0], [0], [1], [0, 0, 1, 1], [], []>} : vector<8x512xbf16>, vector<512x256xbf16>, vector<8x256xf32> -> vector<8x256xf32>
    %c0_9 = arith.constant 0 : index
    %c0_10 = arith.constant 0 : index
    %12 = vector.load %arg5[%c0_9, %c0_10] : memref<1x256xf32, #tpu.memory_space<vmem>>, vector<1x256xf32>
    %13 = vector.broadcast %12 : vector<1x256xf32> to vector<8x256xf32>
    %14 = arith.addf %11, %13 : vector<8x256xf32>
    %cst_11 = arith.constant 0.000000e+00 : f32
    %15 = vector.broadcast %cst_11 : f32 to vector<8x256xf32>
    %16 = arith.maximumf %14, %15 : vector<8x256xf32>
    %17 = arith.truncf %16 : vector<8x256xf32> to vector<8x256xbf16>
    %c0_12 = arith.constant 0 : index
    %c0_13 = arith.constant 0 : index
    %18 = vector.load %arg6[%c0_12, %c0_13] : memref<256x128xbf16, #tpu.memory_space<vmem>>, vector<256x128xbf16>
    %cst_14 = arith.constant dense<0.000000e+00> : vector<8x128xf32>
    %19 = tpu.matmul %17, %18, %cst_14 {dimension_numbers = #tpu.dot_dimension_numbers<[1], [0], [0], [1], [0, 0, 1, 1], [], []>} : vector<8x256xbf16>, vector<256x128xbf16>, vector<8x128xf32> -> vector<8x128xf32>
    %c0_15 = arith.constant 0 : index
    %c0_16 = arith.constant 0 : index
    %20 = vector.load %arg7[%c0_15, %c0_16] : memref<1x128xf32, #tpu.memory_space<vmem>>, vector<1x128xf32>
    %21 = vector.broadcast %20 : vector<1x128xf32> to vector<8x128xf32>
    %22 = arith.addf %19, %21 : vector<8x128xf32>
    %cst_17 = arith.constant 0.000000e+00 : f32
    %23 = vector.broadcast %cst_17 : f32 to vector<8x128xf32>
    %24 = arith.maximumf %22, %23 : vector<8x128xf32>
    %25 = arith.truncf %24 : vector<8x128xf32> to vector<8x128xbf16>
    %c0_18 = arith.constant 0 : index
    %c0_19 = arith.constant 0 : index
    %26 = vector.load %arg8[%c0_18, %c0_19] : memref<128x64xbf16, #tpu.memory_space<vmem>>, vector<128x64xbf16>
    %cst_20 = arith.constant dense<0.000000e+00> : vector<8x64xf32>
    %27 = tpu.matmul %25, %26, %cst_20 {dimension_numbers = #tpu.dot_dimension_numbers<[1], [0], [0], [1], [0, 0, 1, 1], [], []>} : vector<8x128xbf16>, vector<128x64xbf16>, vector<8x64xf32> -> vector<8x64xf32>
    %c0_21 = arith.constant 0 : index
    %c0_22 = arith.constant 0 : index
    %28 = vector.load %arg9[%c0_21, %c0_22] : memref<1x64xf32, #tpu.memory_space<vmem>>, vector<1x64xf32>
    %29 = vector.broadcast %28 : vector<1x64xf32> to vector<8x64xf32>
    %30 = arith.addf %27, %29 : vector<8x64xf32>
    %cst_23 = arith.constant 0.000000e+00 : f32
    %31 = vector.broadcast %cst_23 : f32 to vector<8x64xf32>
    %32 = arith.maximumf %30, %31 : vector<8x64xf32>
    %c0_24 = arith.constant 0 : index
    %c0_25 = arith.constant 0 : index
    %33 = vector.load %arg10[%c0_24, %c0_25] : memref<1x64xf32, #tpu.memory_space<vmem>>, vector<1x64xf32>
    %34 = vector.broadcast %33 : vector<1x64xf32> to vector<8x64xf32>
    %35 = arith.mulf %32, %34 : vector<8x64xf32>
    %cst_26 = arith.constant dense<0.000000e+00> : vector<8xf32>
    %36 = vector.multi_reduction <add>, %35, %cst_26 [1] : vector<8x64xf32> to vector<8xf32>
    %37 = vector.shape_cast %36 : vector<8xf32> to vector<8x1xf32>
    %c0_27 = arith.constant 0 : index
    %c0_28 = arith.constant 0 : index
    %38 = vector.load %arg11[%c0_27, %c0_28] : memref<1x1xf32, #tpu.memory_space<vmem>>, vector<1x1xf32>
    %39 = vector.broadcast %38 : vector<1x1xf32> to vector<8x1xf32>
    %40 = arith.addf %37, %39 : vector<8x1xf32>
    %c0_29 = arith.constant 0 : index
    %c0_30 = arith.constant 0 : index
    %41 = vector.load %arg12[%c0_29, %c0_30] : memref<8x1xf32, #tpu.memory_space<vmem>>, vector<8x1xf32>
    tpu.vector_store %arg12[%c0_29, %c0_30], %40 {strides = array<i32>} : memref<8x1xf32, #tpu.memory_space<vmem>>, vector<8x1xf32>,
    return
  }
  func.func @transform_0(%arg0: i32) -> (i32, i32) {
    %c0_i32 = arith.constant 0 : i32
    %c0_i32_0 = arith.constant 0 : i32
    return %arg0, %c0_i32 : i32, i32
  }
  func.func @transform_1(%arg0: i32) -> (i32, i32) {
    %c0_i32 = arith.constant 0 : i32
    %c0_i32_0 = arith.constant 0 : i32
    %c0_i32_1 = arith.constant 0 : i32
    return %c0_i32, %c0_i32_0 : i32, i32
  }
  func.func @transform_2(%arg0: i32) -> (i32, i32) {
    %c0_i32 = arith.constant 0 : i32
    %c0_i32_0 = arith.constant 0 : i32
    %c0_i32_1 = arith.constant 0 : i32
    return %c0_i32, %c0_i32_0 : i32, i32
  }
  func.func @transform_3(%arg0: i32) -> (i32, i32) {
    %c0_i32 = arith.constant 0 : i32
    %c0_i32_0 = arith.constant 0 : i32
    %c0_i32_1 = arith.constant 0 : i32
    return %c0_i32, %c0_i32_0 : i32, i32
  }
  func.func @transform_4(%arg0: i32) -> (i32, i32) {
    %c0_i32 = arith.constant 0 : i32
    %c0_i32_0 = arith.constant 0 : i32
    %c0_i32_1 = arith.constant 0 : i32
    return %c0_i32, %c0_i32_0 : i32, i32
  }
  func.func @transform_5(%arg0: i32) -> (i32, i32) {
    %c0_i32 = arith.constant 0 : i32
    %c0_i32_0 = arith.constant 0 : i32
    %c0_i32_1 = arith.constant 0 : i32
    return %c0_i32, %c0_i32_0 : i32, i32
  }
  func.func @transform_6(%arg0: i32) -> (i32, i32) {
    %c0_i32 = arith.constant 0 : i32
    %c0_i32_0 = arith.constant 0 : i32
    %c0_i32_1 = arith.constant 0 : i32
    return %c0_i32, %c0_i32_0 : i32, i32
  }
  func.func @transform_7(%arg0: i32) -> (i32, i32) {
    %c0_i32 = arith.constant 0 : i32
    %c0_i32_0 = arith.constant 0 : i32
    %c0_i32_1 = arith.constant 0 : i32
    return %c0_i32, %c0_i32_0 : i32, i32
  }
  func.func @transform_8(%arg0: i32) -> (i32, i32) {
    %c0_i32 = arith.constant 0 : i32
    %c0_i32_0 = arith.constant 0 : i32
    %c0_i32_1 = arith.constant 0 : i32
    return %c0_i32, %c0_i32_0 : i32, i32
  }
  func.func @transform_9(%arg0: i32) -> (i32, i32) {
    %c0_i32 = arith.constant 0 : i32
    %c0_i32_0 = arith.constant 0 : i32
    %c0_i32_1 = arith.constant 0 : i32
    return %c0_i32, %c0_i32_0 : i32, i32
  }
  func.func @transform_10(%arg0: i32) -> (i32, i32) {
    %c0_i32 = arith.constant 0 : i32
    %c0_i32_0 = arith.constant 0 : i32
    %c0_i32_1 = arith.constant 0 : i32
    return %c0_i32, %c0_i32_0 : i32, i32
  }
  func.func @transform_11(%arg0: i32) -> (i32, i32) {
    %c0_i32 = arith.constant 0 : i32
    %c0_i32_0 = arith.constant 0 : i32
    return %arg0, %c0_i32 : i32, i32
  }
}

</mosaic_0001>

<bundles_post_ra>
// kernel: tpu_custom_call.1
= control target key start
LH: loop header
LB: loop body
LE: loop exit
PB: predicated region body
PF: predicated region fallthrough
CT: control target
= control target key end

     0   :  { %s1666_s0 = inlined_call_operand.vmem [shape: f32[8,64], index: 0, kind: input, shape index: {}]   ;;  %s1667_s1 = inlined_call_operand.hbm [shape: bf16[64,512], index: 1, kind: input, shape index: {}]   ;;  %s1668_s2 = inlined_call_operand.vmem [shape: f32[1,512], index: 2, kind: input, shape index: {}]   ;;  %s1669_s3 = inlined_call_operand.hbm [shape: bf16[512,256], index: 3, kind: input, shape index: {}]   ;;  %s1670_s4 = inlined_call_operand.vmem [shape: f32[1,256], index: 4, kind: input, shape index: {}]   ;;  %s1671_s5 = inlined_call_operand.hbm [shape: bf16[256,128], index: 5, kind: input, shape index: {}]   ;;  %s1672_s6 = inlined_call_operand.vmem [shape: f32[1,128], index: 6, kind: input, shape index: {}]   ;;  %s1673_s7 = inlined_call_operand.vmem [shape: bf16[128,64], index: 7, kind: input, shape index: {}]   ;;  %s1674_s8 = inlined_call_operand.vmem [shape: f32[1,64], index: 8, kind: input, shape index: {}]   ;;  %s1675_s9 = inlined_call_operand.vmem [shape: f32[1,64], index: 9, kind: input, shape index: {}]   ;;  %s1676_s10 = inlined_call_operand.<no memory space> [shape: f32[1,1], index: 10, kind: input, shape index: {}]   ;;  %s1677_s11 = inlined_call_operand.vmem [shape: f32[8,1], index: 11, kind: output, shape index: {}]  }
   0x1   :  { %v16_v0 = vstv %s1676_s10 }
   0x2   :  { %17 = vst [vmem:[#allocation2] sm:$0x1] %v16_v0 }
   0x3   :  { %18 = vsyncpa [#allocation4], 0 }
   0x4   :  { %19 = vsyncpa [#allocation6], 0  ;;  %s1487_s19 = smov [#allocation5]   ;;  %s1417_s23 = scalar_lea.hbm %s1669_s3, 8192 }
   0x5   :  { %s41_s20 = sshll.u32 %s1487_s19, 4  ;;  %p1418_p0 = scmp.ne.s32.totalorder %s1669_s3, %s1417_s23  ;;  %s42_s20 = int_to_ptr.vmem [resolvable:$true] %s41_s20 }
   0x6   :  { %p1421_p1 = scmp.lt.u32.totalorder %s1417_s23, %s1669_s3 }
   0x8   :  { %p1423_p2 = pnand %p1421_p1, %p1418_p0 }
   0xa   :  { %1426 = shalt.err (!%p1423_p2)
}
   0xb   :  { %s1427_s10 = scalar_lea.vmem %s42_s20, 8192  ;;  %p1432_p4 = scmp.lt.s32.totalorder %s42_s20, %s42_s20 }
   0xc   :  { %p1428_p3 = scmp.ne.s32.totalorder %s42_s20, %s1427_s10  ;;  %p1433_p5 = scmp.lt.s32.totalorder %s1427_s10, %s1427_s10 }
   0xe   :  { %p1434_p6 = por %p1433_p5, %p1432_p4 }
  0x10   :  { %p1435_p7 = pnand %p1434_p6, %p1428_p3 }
  0x12   :  { %1438 = shalt.err (!%p1435_p7)
}
  0x13   :  { %s1488_s28 = smov 128   ;;  %s1489_s29 = smov 8  }
  0x14   :  { %47 = dma.hbm_to_vmem [thread:$0]  %s1669_s3, 8192, %s42_s20, [#allocation6], %s1488_s28, %s1488_s28, %s1489_s29  }
  0x15   :  { %s1490_s13 = smov [#allocation3]   ;;  %s1439_s17 = scalar_lea.hbm %s1667_s1, 2048 }
  0x16   :  { %s27_s14 = sshll.u32 %s1490_s13, 4  ;;  %p1440_p8 = scmp.ne.s32.totalorder %s1667_s1, %s1439_s17  ;;  %s28_s14 = int_to_ptr.vmem [resolvable:$true] %s27_s14 }
  0x17   :  { %p1443_p9 = scmp.lt.u32.totalorder %s1439_s17, %s1667_s1 }
  0x19   :  { %p1445_p10 = pnand %p1443_p9, %p1440_p8 }
  0x1b   :  { %1448 = shalt.err (!%p1445_p10)
}
  0x1c   :  { %s1449_s23 = scalar_lea.vmem %s28_s14, 2048  ;;  %p1454_p12 = scmp.lt.s32.totalorder %s28_s14, %s28_s14 }
  0x1d   :  { %p1450_p11 = scmp.ne.s32.totalorder %s28_s14, %s1449_s23  ;;  %p1455_p13 = scmp.lt.s32.totalorder %s1449_s23, %s1449_s23 }
  0x1f   :  { %p1456_p0 = por %p1455_p13, %p1454_p12 }
  0x21   :  { %p1457_p1 = pnand %p1456_p0, %p1450_p11 }
  0x23   :  { %1460 = shalt.err (!%p1457_p1)
}
  0x24   :  { %s1491_s3 = smov 256   ;;  %s1492_s20 = smov 16  }
  0x25   :  { %33 = dma.hbm_to_vmem [thread:$0]  %s1667_s1, 2048, %s28_s14, [#allocation4], %s1491_s3, %s1491_s3, %s1492_s20  }
  0x26   :  { %s1493_s26 = smov [#allocation7]   ;;  %s1461_s29 = scalar_lea.hbm %s1671_s5, 2048 }
  0x27   :  { %s55_s27 = sshll.u32 %s1493_s26, 4  ;;  %p1462_p2 = scmp.ne.s32.totalorder %s1671_s5, %s1461_s29  ;;  %s56_s27 = int_to_ptr.vmem [resolvable:$true] %s55_s27 }
  0x28   :  { %p1465_p3 = scmp.lt.u32.totalorder %s1461_s29, %s1671_s5 }
  0x2a   :  { %p1467_p4 = pnand %p1465_p3, %p1462_p2 }
  0x2c   :  { %1470 = shalt.err (!%p1467_p4)
}
  0x2d   :  { %s1471_s16 = scalar_lea.vmem %s56_s27, 2048  ;;  %p1476_p6 = scmp.lt.s32.totalorder %s56_s27, %s56_s27 }
  0x2e   :  { %p1472_p5 = scmp.ne.s32.totalorder %s56_s27, %s1471_s16  ;;  %p1477_p7 = scmp.lt.s32.totalorder %s1471_s16, %s1471_s16 }
  0x30   :  { %p1478_p8 = por %p1477_p7, %p1476_p6 }
  0x32   :  { %p1479_p9 = pnand %p1478_p8, %p1472_p5 }
  0x34   :  { %1482 = shalt.err (!%p1479_p9)
}
  0x35   :  { %s1494_s1 = smov 64   ;;  %s1495_s14 = smov 4  }
  0x36   :  { %61 = dma.hbm_to_vmem [thread:$0]  %s1671_s5, 2048, %s56_s27, [#allocation6], %s1494_s1, %s1494_s1, %s1495_s14  }
  0x37   :  { %1483 = dma.done.wait [#allocation4], 2048  }
  0x38   :  { %1484 = vsyncadd [#allocation4], 4294965248 }
  0x39   :  { %1485 = dma.done.wait [#allocation6], 10240  }
  0x3a   :  { %1486 = vsyncadd [#allocation6], 4294957056  ;;  %v1496_v1 = vmov 0   ;;  %v1273_v2 = vld [vmem:[#allocation3 + $0x4] ss:$16 sps:$4 sm:$0xff]   ;;  %vm202_vm0 = vcmask 523264  }
  0x3b   :  { %238 = vmatprep.mubr.bf16.mxu1 %v1496_v1  ;;  %v1275_v3 = vld [vmem:[#allocation3] ss:$16 sps:$4 sm:$0xff]   ;;  %206 = vmatprep.subr.bf16.mxu1 %v1273_v2  ;;  %v1276_v4 = vld [vmem:[#allocation3 + $0x24] ss:$16 sps:$4 sm:$0xff]   ;;  %v1287_v11 = vld [vmem:[#allocation3 + $0xc] ss:$16 sps:$4 sm:$0xff]  }
  0x3c   :  { %207 = vmatpush1.bf16.msra.mxu1 %v1275_v3  ;;  %v1278_v5 = vld [vmem:[#allocation3 + $0x20] ss:$16 sps:$4 sm:$0xff]   ;;  %v1279_v6 = vld [vmem:[#allocation3 + $0x44] ss:$16 sps:$4 sm:$0xff]   ;;  %v1285_v16 = vld [vmem:[#allocation3 + $0x8] ss:$16 sps:$4 sm:$0xff]  }
  0x3d   :  { %208 = vmatprep.subr.bf16.mxu1 %v1276_v4  ;;  %v1281_v7 = vld [vmem:[#allocation3 + $0x40] ss:$16 sps:$4 sm:$0xff]   ;;  %v1282_v8 = vld [vmem:[#allocation3 + $0x64] ss:$16 sps:$4 sm:$0xff]   ;;  %v1290_v18 = vld [vmem:[#allocation3 + $0x2c] ss:$16 sps:$4 sm:$0xff]  }
  0x3e   :  { %v1284_v9 = vld [vmem:[#allocation3 + $0x60] ss:$16 sps:$4 sm:$0xff]   ;;  %v1297_v12 = vld [vmem:[#allocation5 + $0x4] ss:$8 sps:$4 sm:$0xff]   ;;  %v1300_v14 = vld [vmem:[#allocation5 + $0x14] ss:$8 sps:$4 sm:$0xff]  }
  0x3f   :  { %v82_v10 = vld [vmem:[%s1666_s0] sm:$0xff]  ;;  %692 = vmatprep.subr.bf16.mxu0 %v1297_v12  ;;  %v1302_v17 = vld [vmem:[#allocation5 + $0x10] ss:$8 sps:$4 sm:$0xff]   ;;  %v1395_v55 = vld [vmem:[#allocation7 + $0x48] sm:$0xff]   ;;  %vm1498_vm1 = vmmov 0   ;;  %vm1086_vm2 = vcmask 7168  }
  0x40   :  { %209 = vmatpush1.bf16.msra.mxu1 %v1278_v5  ;;  %v1299_v13 = vld [vmem:[#allocation5] ss:$8 sps:$4 sm:$0xff]   ;;  %v83_v15 = vpack.c.bf16 %v82_v10, %v82_v10  ;;  %v1303_v19 = vld [vmem:[#allocation5 + $0x24] ss:$8 sps:$4 sm:$0xff]   ;;  %v1306_v22 = vld [vmem:[#allocation5 + $0x34] ss:$8 sps:$4 sm:$0xff]  }
  0x41   :  { %210 = vmatprep.subr.bf16.mxu1 %v1279_v6  ;;  %693 = vmatpush1.bf16.msra.mxu0 %v1299_v13  ;;  %v1288_v20 = vld [vmem:[#allocation3 + $0x28] ss:$16 sps:$4 sm:$0xff]   ;;  %v1293_v23 = vld [vmem:[#allocation3 + $0x4c] ss:$16 sps:$4 sm:$0xff]   ;;  %v1393_v53 = vld [vmem:[#allocation7 + $0x40] sm:$0xff]  }
  0x42   :  { %694 = vmatprep.subr.bf16.mxu0 %v1300_v14  ;;  %v1305_v21 = vld [vmem:[#allocation5 + $0x20] ss:$8 sps:$4 sm:$0xff]   ;;  %v1308_v25 = vld [vmem:[#allocation5 + $0x30] ss:$8 sps:$4 sm:$0xff]   ;;  %v1309_v26 = vld [vmem:[#allocation5 + $0x44] ss:$8 sps:$4 sm:$0xff]  }
  0x43   :  { %v1291_v24 = vld [vmem:[#allocation3 + $0x48] ss:$16 sps:$4 sm:$0xff]   ;;  %v1296_v27 = vld [vmem:[#allocation3 + $0x6c] ss:$16 sps:$4 sm:$0xff]   ;;  %v1394_v54 = vld [vmem:[#allocation7] sm:$0xff]  }
  0x44   :  { %211 = vmatpush1.bf16.msra.mxu1 %v1281_v7  ;;  %v1294_v28 = vld [vmem:[#allocation3 + $0x68] ss:$16 sps:$4 sm:$0xff]   ;;  %v1312_v30 = vld [vmem:[#allocation5 + $0x54] ss:$8 sps:$4 sm:$0xff]   ;;  %v1315_v32 = vld [vmem:[#allocation5 + $0x64] ss:$8 sps:$4 sm:$0xff]  }
  0x45   :  { %212 = vmatprep.subr.bf16.mxu1 %v1282_v8  ;;  %695 = vmatpush1.bf16.msra.mxu0 %v1302_v17  ;;  %v1311_v29 = vld [vmem:[#allocation5 + $0x40] ss:$8 sps:$4 sm:$0xff]   ;;  %v1314_v31 = vld [vmem:[#allocation5 + $0x50] ss:$8 sps:$4 sm:$0xff]   ;;  %v1318_v34 = vld [vmem:[#allocation5 + $0x74] ss:$8 sps:$4 sm:$0xff]  }
  0x46   :  { %696 = vmatprep.subr.bf16.mxu0 %v1303_v19  ;;  %v1317_v33 = vld [vmem:[#allocation5 + $0x60] ss:$8 sps:$4 sm:$0xff]   ;;  %v1320_v35 = vld [vmem:[#allocation5 + $0x70] ss:$8 sps:$4 sm:$0xff]   ;;  %v1321_v36 = vld [vmem:[#allocation5 + $0x84] ss:$8 sps:$4 sm:$0xff]  }
  0x47   :  { %v1323_v37 = vld [vmem:[#allocation5 + $0x80] ss:$8 sps:$4 sm:$0xff]   ;;  %v1324_v38 = vld [vmem:[#allocation5 + $0x94] ss:$8 sps:$4 sm:$0xff]   ;;  %v1326_v39 = vld [vmem:[#allocation5 + $0x90] ss:$8 sps:$4 sm:$0xff]  }
  0x48   :  { %213 = vmatpush1.bf16.msra.mxu1 %v1284_v9  ;;  %v1327_v40 = vld [vmem:[#allocation5 + $0xa4] ss:$8 sps:$4 sm:$0xff]   ;;  %v1329_v41 = vld [vmem:[#allocation5 + $0xa0] ss:$8 sps:$4 sm:$0xff]   ;;  %v1330_v42 = vld [vmem:[#allocation5 + $0xb4] ss:$8 sps:$4 sm:$0xff]  }
  0x49   :  { %247 = vmatprep.subr.bf16.mxu1 %v1287_v11  ;;  %697 = vmatpush1.bf16.msra.mxu0 %v1305_v21  ;;  %v1332_v43 = vld [vmem:[#allocation5 + $0xb0] ss:$8 sps:$4 sm:$0xff]   ;;  %v1333_v44 = vld [vmem:[#allocation5 + $0xc4] ss:$8 sps:$4 sm:$0xff]   ;;  %v1335_v45 = vld [vmem:[#allocation5 + $0xc0] ss:$8 sps:$4 sm:$0xff]  }
  0x4a   :  { %698 = vmatprep.subr.bf16.mxu0 %v1306_v22  ;;  %v1336_v46 = vld [vmem:[#allocation5 + $0xd4] ss:$8 sps:$4 sm:$0xff]   ;;  %v1338_v47 = vld [vmem:[#allocation5 + $0xd0] ss:$8 sps:$4 sm:$0xff]   ;;  %v1339_v48 = vld [vmem:[#allocation5 + $0xe4] ss:$8 sps:$4 sm:$0xff]  }
  0x4b   :  { %1110 = vmatmul.mubr.msk.bf16.vlgmr.msra.gmra.mrb[0].mxu1 %vm202_vm0, %v83_v15  ;;  %v1341_v49 = vld [vmem:[#allocation5 + $0xe0] ss:$8 sps:$4 sm:$0xff]   ;;  %v1342_v50 = vld [vmem:[#allocation5 + $0xf4] ss:$8 sps:$4 sm:$0xff]   ;;  %v1344_v51 = vld [vmem:[#allocation5 + $0xf0] ss:$8 sps:$4 sm:$0xff]  }
  0x4c   :  { %248 = vmatpush1.bf16.msra.mxu1 %v1285_v16  ;;  %279 = vmatprep.mubr.bf16.mxu1 %v1496_v1  ;;  %v1347_v52 = vld [vmem:[#allocation5 + $0x104] ss:$8 sps:$4 sm:$0xff]   ;;  %v1397_v57 = vld [vmem:[#allocation7 + $0x50] sm:$0xff]   ;;  %v1399_v59 = vld [vmem:[#allocation7 + $0x58] sm:$0xff]   ;;  %v102_v1 = vlaneseq }
  0x4d   :  { %249 = vmatprep.subr.bf16.mxu1 %v1290_v18  ;;  %699 = vmatpush1.bf16.msra.mxu0 %v1308_v25  ;;  %v1396_v56 = vld [vmem:[#allocation7 + $0x8] sm:$0xff]   ;;  %v1398_v58 = vld [vmem:[#allocation7 + $0x10] sm:$0xff]   ;;  %v1400_v60 = vld [vmem:[#allocation7 + $0x18] sm:$0xff]  }
  0x4e   :  { %700 = vmatprep.subr.bf16.mxu0 %v1309_v26  ;;  %v1401_v61 = vld [vmem:[#allocation7 + $0x60] sm:$0xff]   ;;  %v1403_v63 = vld [vmem:[#allocation7 + $0x68] sm:$0xff]   ;;  %v1603_v2 = vshrl.u32 %v102_v1, 7  ;;  %v1350_v19 = vld [vmem:[#allocation5 + $0x114] ss:$8 sps:$4 sm:$0xff]  }
  0x4f   :  { %v1402_v62 = vld [vmem:[#allocation7 + $0x20] sm:$0xff]   ;;  %v1404_v0 = vld [vmem:[#allocation7 + $0x28] sm:$0xff]   ;;  %v1356_v25 = vld [vmem:[#allocation5 + $0x134] ss:$8 sps:$4 sm:$0xff]  }
  0x50   :  { %250 = vmatpush1.bf16.msra.mxu1 %v1288_v20  ;;  %v104_v3 = vsub.s32 0, %v1603_v2  ;;  %v1609_v4 = vld [vmem:[%s1668_s2] sm:$0xf]  ;;  %v108_v5 = vsub.s32 1, %v1603_v2  ;;  %v1348_v20 = vld [vmem:[#allocation5 + $0x110] ss:$8 sps:$4 sm:$0xff]  }
  0x51   :  { %251 = vmatprep.subr.bf16.mxu1 %v1293_v23  ;;  %701 = vmatpush1.bf16.msra.mxu0 %v1311_v29  ;;  %v1345_v17 = vld [vmem:[#allocation5 + $0x100] ss:$8 sps:$4 sm:$0xff]   ;;  %v116_v21 = vsub.s32 3, %v1603_v2  ;;  %v1353_v22 = vld [vmem:[#allocation5 + $0x124] ss:$8 sps:$4 sm:$0xff]   ;;  %v1407_v1 = vld [vmem:[#allocation7 + $0x78] sm:$0xff]  }
  0x52   :  { %702 = vmatprep.subr.bf16.mxu0 %v1312_v30  ;;  %v105_v6 = vrot.slane %v1609_v4, %v104_v3  ;;  %v109_v7 = vrot.slane %v1609_v4, %v108_v5  ;;  %v1351_v23 = vld [vmem:[#allocation5 + $0x120] ss:$8 sps:$4 sm:$0xff]  }
  0x54   :  { %252 = vmatpush1.bf16.msra.mxu1 %v1291_v24  ;;  %v117_v24 = vrot.slane %v1609_v4, %v116_v21  ;;  %v1413_v21 = vld [vmem:[%s1673_s7 + $0x20] sm:$0xff]  }
  0x55   :  { %253 = vmatprep.subr.bf16.mxu1 %v1296_v27  ;;  %703 = vmatpush1.bf16.msra.mxu0 %v1314_v31  ;;  %v1359_v31 = vld [vmem:[#allocation5 + $0x144] ss:$8 sps:$4 sm:$0xff]  }
  0x56   :  { %704 = vmatprep.subr.bf16.mxu0 %v1315_v32 }
  0x58   :  { %254 = vmatpush1.bf16.msra.mxu1 %v1294_v28  ;;  %v1354_v28 = vld [vmem:[#allocation5 + $0x130] ss:$8 sps:$4 sm:$0xff]  }
  0x59   :  { %705 = vmatpush1.bf16.msra.mxu0 %v1317_v33  ;;  %1204 = vmatprep.subr.bf16.mxu1 %v1393_v53  ;;  %v1386_v53 = vld [vmem:[#allocation5 + $0x1d4] ss:$8 sps:$4 sm:$0xff]  }
  0x5a   :  { %706 = vmatprep.subr.bf16.mxu0 %v1318_v34  ;;  %v1357_v34 = vld [vmem:[#allocation5 + $0x140] ss:$8 sps:$4 sm:$0xff]  }
  0x5b   :  { %1111 = vmatmul.mubr.msk.bf16.vlgmr.msra.gmra.mrb[4].mxu1 %vm202_vm0, %v83_v15 }
  0x5c   :  { %1205 = vmatpush3.bf16.msra.mxu1 %v1394_v54  ;;  %v1384_v54 = vld [vmem:[#allocation5 + $0x1d0] ss:$8 sps:$4 sm:$0xff]  }
  0x5d   :  { %707 = vmatpush1.bf16.msra.mxu0 %v1320_v35  ;;  %1206 = vmatprep.subr.bf16.mxu1 %v1395_v55 }
  0x5e   :  { %708 = vmatprep.subr.bf16.mxu0 %v1321_v36  ;;  %v1362_v36 = vld [vmem:[#allocation5 + $0x154] ss:$8 sps:$4 sm:$0xff]  }
  0x60   :  { %1207 = vmatpush3.bf16.msra.mxu1 %v1396_v56  ;;  %v1389_v56 = vld [vmem:[#allocation5 + $0x1e4] ss:$8 sps:$4 sm:$0xff]  }
  0x61   :  { %709 = vmatpush1.bf16.msra.mxu0 %v1323_v37  ;;  %1208 = vmatprep.subr.bf16.mxu1 %v1397_v57  ;;  %v1360_v37 = vld [vmem:[#allocation5 + $0x150] ss:$8 sps:$4 sm:$0xff]   ;;  %v1387_v57 = vld [vmem:[#allocation5 + $0x1e0] ss:$8 sps:$4 sm:$0xff]  }
  0x62   :  { %710 = vmatprep.subr.bf16.mxu0 %v1324_v38  ;;  %v1365_v38 = vld [vmem:[#allocation5 + $0x164] ss:$8 sps:$4 sm:$0xff]  }
  0x64   :  { %1209 = vmatpush3.bf16.msra.mxu1 %v1398_v58 }
  0x65   :  { %711 = vmatpush1.bf16.msra.mxu0 %v1326_v39  ;;  %1210 = vmatprep.subr.bf16.mxu1 %v1399_v59  ;;  %v1363_v39 = vld [vmem:[#allocation5 + $0x160] ss:$8 sps:$4 sm:$0xff]   ;;  %v1392_v59 = vld [vmem:[#allocation5 + $0x1f4] ss:$8 sps:$4 sm:$0xff]  }
  0x66   :  { %712 = vmatprep.subr.bf16.mxu0 %v1327_v40  ;;  %v1368_v40 = vld [vmem:[#allocation5 + $0x174] ss:$8 sps:$4 sm:$0xff]  }
  0x68   :  { %1211 = vmatpush3.bf16.msra.mxu1 %v1400_v60  ;;  %v1390_v60 = vld [vmem:[#allocation5 + $0x1f0] ss:$8 sps:$4 sm:$0xff]  }
  0x69   :  { %713 = vmatpush1.bf16.msra.mxu0 %v1329_v41  ;;  %1212 = vmatprep.subr.bf16.mxu1 %v1401_v61  ;;  %v1366_v41 = vld [vmem:[#allocation5 + $0x170] ss:$8 sps:$4 sm:$0xff]  }
  0x6a   :  { %714 = vmatprep.subr.bf16.mxu0 %v1330_v42  ;;  %v1371_v42 = vld [vmem:[#allocation5 + $0x184] ss:$8 sps:$4 sm:$0xff]  }
  0x6c   :  { %1213 = vmatpush3.bf16.msra.mxu1 %v1402_v62 }
  0x6d   :  { %715 = vmatpush1.bf16.msra.mxu0 %v1332_v43  ;;  %1214 = vmatprep.subr.bf16.mxu1 %v1403_v63  ;;  %v1369_v43 = vld [vmem:[#allocation5 + $0x180] ss:$8 sps:$4 sm:$0xff]   ;;  %v1405_v63 = vld [vmem:[#allocation7 + $0x70] sm:$0xff]  }
  0x6e   :  { %716 = vmatprep.subr.bf16.mxu0 %v1333_v44  ;;  %v1374_v44 = vld [vmem:[#allocation5 + $0x194] ss:$8 sps:$4 sm:$0xff]  }
  0x70   :  { %1215 = vmatpush3.bf16.msra.mxu1 %v1404_v0  ;;  %v1406_v0 = vld [vmem:[#allocation7 + $0x30] sm:$0xff]  }
  0x71   :  { %717 = vmatpush1.bf16.msra.mxu0 %v1335_v45  ;;  %v1372_v45 = vld [vmem:[#allocation5 + $0x190] ss:$8 sps:$4 sm:$0xff]   ;;  %1216 = vmatprep.subr.bf16.mxu1 %v1405_v63 }
  0x72   :  { %718 = vmatprep.subr.bf16.mxu0 %v1336_v46  ;;  %v1377_v46 = vld [vmem:[#allocation5 + $0x1a4] ss:$8 sps:$4 sm:$0xff]  }
  0x74   :  { %1217 = vmatpush3.bf16.msra.mxu1 %v1406_v0 }
  0x75   :  { %719 = vmatpush1.bf16.msra.mxu0 %v1338_v47  ;;  %v1375_v47 = vld [vmem:[#allocation5 + $0x1a0] ss:$8 sps:$4 sm:$0xff]   ;;  %1218 = vmatprep.subr.bf16.mxu1 %v1407_v1 }
  0x76   :  { %720 = vmatprep.subr.bf16.mxu0 %v1339_v48  ;;  %v1380_v48 = vld [vmem:[#allocation5 + $0x1b4] ss:$8 sps:$4 sm:$0xff]  }
  0x79   :  { %721 = vmatpush1.bf16.msra.mxu0 %v1341_v49  ;;  %v1378_v49 = vld [vmem:[#allocation5 + $0x1b0] ss:$8 sps:$4 sm:$0xff]  }
  0x7a   :  { %722 = vmatprep.subr.bf16.mxu0 %v1342_v50  ;;  %v1383_v50 = vld [vmem:[#allocation5 + $0x1c4] ss:$8 sps:$4 sm:$0xff]  }
  0x7d   :  { %723 = vmatpush1.bf16.msra.mxu0 %v1344_v51  ;;  %v1381_v51 = vld [vmem:[#allocation5 + $0x1c0] ss:$8 sps:$4 sm:$0xff]  }
  0x7e   :  { %733 = vmatprep.subr.bf16.mxu0 %v1347_v52  ;;  %v112_v52 = vsub.s32 2, %v1603_v2  ;;  %v1410_v2 = vld [vmem:[%s1673_s7 + $0x8] sm:$0xff]  }
  0x80   :  { %v113_v55 = vrot.slane %v1609_v4, %v112_v52  ;;  %v1408_v4 = vld [vmem:[#allocation7 + $0x38] sm:$0xff]  }
  0x81   :  { %1219 = vmatpush3.bf16.msra.mxu1 %v1408_v4 }
 0x11e   :  { %v240_v8 = vpop.f32.mrb[0].mxu1 }
 0x11f   :  { %v241_v9 = vadd.f32 %v240_v8, %v105_v6  ;;  %v242_v10 = vpop.f32.mrb[1].mxu1  ;;  %v1497_v6 = vmov 0.0  }
 0x120   :  { %v243_v11 = vadd.f32 %v242_v10, %v109_v7  ;;  %v244_v12 = vpop.f32.mrb[2].mxu1  ;;  %1235 = vmatprep.subr.bf16.mxu1 %v1497_v6  ;;  %v360_v7 = vld [vmem:[%s1670_s4] sm:$0x3] }
 0x121   :  { %v288_v13 = vmax.f32 %v241_v9, 0.0  ;;  %v245_v14 = vpop.f32.mrb[3].mxu1  ;;  %v365_v8 = vrot.slane %v360_v7, %v104_v3  ;;  %v369_v9 = vrot.slane %v360_v7, %v108_v5  ;;  %v1411_v3 = vld [vmem:[%s1673_s7 + $0x10] sm:$0xff]   ;;  %v1412_v5 = vld [vmem:[%s1673_s7 + $0x18] sm:$0xff]  }
 0x122   :  { %v289_v15 = vmax.f32 %v243_v11, 0.0 }
 0x123   :  { %v292_v18 = vpack.c.bf16 %v288_v13, %v288_v13 }
 0x124   :  { %v293_v16 = vpack.c.bf16 %v289_v15, %v289_v15 }
 0x126   :  { %724 = vmatprep.mubr.bf16.mxu0 %v293_v16 }
 0x127   :  { %725 = vmatmul.mubr.bf16.vlgmr.msra.gmra.mrb[0].mxu0 %v292_v18 }
 0x128   :  { %734 = vmatpush1.bf16.msra.mxu0 %v1345_v17 }
 0x129   :  { %735 = vmatprep.subr.bf16.mxu0 %v1350_v19  ;;  %v1409_v19 = vld [vmem:[%s1673_s7] sm:$0xff]  }
 0x12c   :  { %736 = vmatpush1.bf16.msra.mxu0 %v1348_v20 }
 0x12d   :  { %737 = vmatprep.subr.bf16.mxu0 %v1353_v22  ;;  %v1414_v22 = vld [vmem:[%s1673_s7 + $0x28] sm:$0xff]  }
 0x12e   :  { %v281_v26 = vpop.f32.mrb[4].mxu1 }
 0x12f   :  { %v283_v27 = vpop.f32.mrb[5].mxu1  ;;  %v282_v58 = vadd.f32 %v281_v26, %v113_v55  ;;  %v1176_v26 = vld [vmem:[%s1672_s6] ss:$0 sm:$0xff] }
 0x130   :  { %738 = vmatpush1.bf16.msra.mxu0 %v1351_v23  ;;  %v284_v29 = vadd.f32 %v283_v27, %v117_v24  ;;  %v285_v30 = vpop.f32.mrb[6].mxu1  ;;  %v1415_v23 = vld [vmem:[%s1673_s7 + $0x30] sm:$0xff]   ;;  %v1416_v24 = vld [vmem:[%s1673_s7 + $0x38] sm:$0xff]  }
 0x131   :  { %739 = vmatprep.subr.bf16.mxu0 %v1356_v25  ;;  %v286_v32 = vpop.f32.mrb[7].mxu1  ;;  %v290_v61 = vmax.f32 %v282_v58, 0.0 }
 0x132   :  { %v291_v33 = vmax.f32 %v284_v29, 0.0 }
 0x133   :  { %v294_v62 = vpack.c.bf16 %v290_v61, %v290_v61 }
 0x134   :  { %740 = vmatpush1.bf16.msra.mxu0 %v1354_v28  ;;  %v295_v35 = vpack.c.bf16 %v291_v33, %v291_v33 }
 0x135   :  { %741 = vmatprep.subr.bf16.mxu0 %v1359_v31 }
 0x136   :  { %765 = vmatprep.mubr.bf16.mxu0 %v295_v35 }
 0x138   :  { %742 = vmatpush1.bf16.msra.mxu0 %v1357_v34  ;;  %v1193_v34 = vld [vmem:[%s1674_s8] ss:$0 sm:$0xff] }
 0x139   :  { %743 = vmatprep.subr.bf16.mxu0 %v1362_v36 }
 0x13c   :  { %744 = vmatpush1.bf16.msra.mxu0 %v1360_v37 }
 0x13d   :  { %745 = vmatprep.subr.bf16.mxu0 %v1365_v38 }
 0x140   :  { %746 = vmatpush1.bf16.msra.mxu0 %v1363_v39  ;;  %v1202_v39 = vld [vmem:[%s1675_s9] ss:$0 sm:$0xff] }
 0x141   :  { %747 = vmatprep.subr.bf16.mxu0 %v1368_v40 }
 0x144   :  { %748 = vmatpush1.bf16.msra.mxu0 %v1366_v41 }
 0x145   :  { %749 = vmatprep.subr.bf16.mxu0 %v1371_v42 }
 0x148   :  { %750 = vmatpush1.bf16.msra.mxu0 %v1369_v43 }
 0x149   :  { %751 = vmatprep.subr.bf16.mxu0 %v1374_v44  ;;  %v1203_v44 = vld [vmem:[#allocation2] ss:$0 sm:$0xff] }
 0x14c   :  { %752 = vmatpush1.bf16.msra.mxu0 %v1372_v45 }
 0x14d   :  { %753 = vmatprep.subr.bf16.mxu0 %v1377_v46 }
 0x150   :  { %754 = vmatpush1.bf16.msra.mxu0 %v1375_v47 }
 0x151   :  { %755 = vmatprep.subr.bf16.mxu0 %v1380_v48 }
 0x154   :  { %756 = vmatpush1.bf16.msra.mxu0 %v1378_v49 }
 0x155   :  { %757 = vmatprep.subr.bf16.mxu0 %v1383_v50 }
 0x158   :  { %758 = vmatpush1.bf16.msra.mxu0 %v1381_v51 }
 0x159   :  { %759 = vmatprep.subr.bf16.mxu0 %v1386_v53 }
 0x15c   :  { %760 = vmatpush1.bf16.msra.mxu0 %v1384_v54 }
 0x15d   :  { %761 = vmatprep.subr.bf16.mxu0 %v1389_v56 }
 0x160   :  { %762 = vmatpush1.bf16.msra.mxu0 %v1387_v57 }
 0x161   :  { %763 = vmatprep.subr.bf16.mxu0 %v1392_v59 }
 0x164   :  { %764 = vmatpush1.bf16.msra.mxu0 %v1390_v60 }
 0x167   :  { %766 = vmatmul.mubr.bf16.vlgmr.msra.gmra.mrb[0].mxu0 %v294_v62 }
 0x23a   :  { %v767_v10 = vpop.f32.mrb[0].mxu0 }
 0x23b   :  { %v1255_v11 = vadd.f32 %v767_v10, %v365_v8  ;;  %v769_v12 = vpop.f32.mrb[1].mxu0 }
 0x23c   :  { %v1256_v13 = vadd.f32 %v769_v12, %v369_v9  ;;  %v771_v14 = vpop.f32.mrb[2].mxu0 }
 0x23d   :  { %v774_v15 = vmax.f32 %v1255_v11, 0.0  ;;  %v772_v16 = vpop.f32.mrb[3].mxu0 }
 0x23e   :  { %v775_v17 = vmax.f32 %v1256_v13, 0.0 }
 0x23f   :  { %v776_v20 = vpack.c.bf16 %v774_v15, %v774_v15 }
 0x240   :  { %v777_v18 = vpack.c.bf16 %v775_v17, %v775_v17 }
 0x242   :  { %945 = vmatprep.mubr.bf16.mxu1 %v777_v18 }
 0x243   :  { %946 = vmatmul.mubr.bf16.vlgmr.msra.gmra.mrb[8].mxu1 %v776_v20 }
 0x244   :  { %1236 = vmatpush3.bf16.msra.mxu1 %v1409_v19  ;;  %1251 = vmatprep.mubr.msk.bf16.mxu1 %vm1498_vm1, %v1497_v6 }
 0x245   :  { %1237 = vmatprep.subr.bf16.mxu1 %v1497_v6 }
 0x248   :  { %1238 = vmatpush3.bf16.msra.mxu1 %v1410_v2 }
 0x249   :  { %1239 = vmatprep.subr.bf16.mxu1 %v1497_v6 }
 0x24c   :  { %1240 = vmatpush3.bf16.msra.mxu1 %v1411_v3 }
 0x24d   :  { %1241 = vmatprep.subr.bf16.mxu1 %v1497_v6 }
 0x250   :  { %1242 = vmatpush3.bf16.msra.mxu1 %v1412_v5 }
 0x251   :  { %1243 = vmatprep.subr.bf16.mxu1 %v1497_v6 }
 0x254   :  { %1244 = vmatpush3.bf16.msra.mxu1 %v1413_v21 }
 0x255   :  { %1245 = vmatprep.subr.bf16.mxu1 %v1497_v6 }
 0x258   :  { %1246 = vmatpush3.bf16.msra.mxu1 %v1414_v22 }
 0x259   :  { %1247 = vmatprep.subr.bf16.mxu1 %v1497_v6 }
 0x25c   :  { %1248 = vmatpush3.bf16.msra.mxu1 %v1415_v23 }
 0x25d   :  { %1249 = vmatprep.subr.bf16.mxu1 %v1497_v6 }
 0x260   :  { %1250 = vmatpush3.bf16.msra.mxu1 %v1416_v24 }
 0x316   :  { %v1220_v25 = vpop.f32.mrb[8].mxu1 }
 0x317   :  { %v1221_v27 = vpop.f32.mrb[9].mxu1 }
 0x318   :  { %v1222_v28 = vadd.f32 %v1221_v27, %v1220_v25  ;;  %v1223_v29 = vpop.f32.mrb[10].mxu1 }
 0x319   :  { %v1224_v30 = vpop.f32.mrb[11].mxu1 }
 0x31a   :  { %v948_v31 = vadd.f32 %v1222_v28, %v1176_v26 }
 0x31c   :  { %v953_v32 = vmax.f32 %v948_v31, 0.0 }
 0x31e   :  { %v954_v33 = vpack.c.bf16 %v953_v32, %v953_v32 }
 0x320   :  { %1252 = vmatmul.mubr.bf16.vlgmr.msra.gmra.mrb[12].mxu1 %v954_v33 }
 0x3f3   :  { %v1060_v35 = vpop.f32.mrb[12].mxu1 }
 0x3f4   :  { %v1061_v36 = vadd.f32 %v1193_v34, %v1060_v35  ;;  %v1253_v37 = vpop.f32.mrb[13].mxu1 }
 0x3f5   :  { %v1063_v38 = vpop.f32.mrb[14].mxu1 }
 0x3f6   :  { %v1066_v40 = vmax.f32 %v1061_v36, 0.0  ;;  %v1254_v41 = vpop.f32.mrb[15].mxu1 }
 0x3f8   :  { %v1074_v42 = vmul.f32 %v1202_v39, %v1066_v40 }
 0x3fa   :  { %v1075_v43 = vsel %vm202_vm0, %v1074_v42, 0.0 }
 0x3fb   :  { %1076 = vadd.xlane.f32.xlu0 %v1075_v43 }
 0x488   :  { %v1077_v45 = vpop.xlane.xlu0 %1076 }
 0x489   :  { %v1085_v46 = vadd.f32 %v1203_v44, %v1077_v45 }
 0x48b   :  { %1087 = vst.msk [vmem:[%s1677_s11] sm:$0xff] %vm1086_vm2, %v1085_v46 }
 0x48c   :  { %1092 = vsyncpa [#allocation4], 1 }
 0x48d   :  { %1093 = vsyncpa [#allocation6], 1 }

</bundles_post_ra>
